<compile_context>
chip_gen: v7x
topology: tpu7x:2x2x1
jax: 0.10.0
libtpu: 0.0.40
codegen_flags: <defaults>
</compile_context>

<pallas_src>
import jax
import jax.numpy as jnp
from jax.experimental import pallas as pl
from jax.experimental.pallas import tpu as pltpu


_VMEM_LIMIT = 32 * 1024 * 1024  # explicit scoped-VMEM limit (v5e default is only 16 MiB)


def _round_up(x, m):
    return ((x + m - 1) // m) * m


def _pick_tile(total, align, target, want_multi=False):
    """Largest divisor of `total` that is a multiple of `align` and <= `target`.

    `total` must already be a multiple of `align` (so `align` always works).
    If `want_multi`, prefer a tile strictly smaller than `total` (>= 2 grid
    blocks, so both v7x TensorCores are used) when such a divisor exists.
    """
    target = max(align, min(target, total))
    best = align
    best_multi = None
    d = align
    while d <= target:
        if total % d == 0:
            best = d
            if d < total:
                best_multi = d
        d += align
    if want_multi and best == total and best_multi is not None:
        return best_multi
    return best


# ---------------------------------------------------------------------------
# Kernels
# ---------------------------------------------------------------------------
def _additive_kernel(x1_ref, x2_ref, o_ref):
    # output = relu((x1 + x2) / 2), elementwise on a lane-dense tile
    o_ref[...] = jnp.maximum((x1_ref[...] + x2_ref[...]) * 0.5, 0.0).astype(o_ref.dtype)


def _concat_linear_kernel_f32(x1_ref, x2_ref, w1_ref, w2_ref, b_ref, o_ref):
    # output = relu(concat(x1, x2) @ W^T + b) = relu(x1 @ W1 + x2 @ W2 + b)
    # f32 output: accumulate directly into o_ref (resident across K), no scratch.
    k = pl.program_id(2)
    p = (jnp.dot(x1_ref[...], w1_ref[...], preferred_element_type=jnp.float32)
         + jnp.dot(x2_ref[...], w2_ref[...], preferred_element_type=jnp.float32))

    @pl.when(k == 0)
    def _():
        o_ref[...] = p + b_ref[...]

    @pl.when(k != 0)
    def _():
        o_ref[...] += p

    @pl.when(k == pl.num_programs(2) - 1)
    def _():
        o_ref[...] = jnp.maximum(o_ref[...], 0.0)


def _concat_linear_kernel_acc(x1_ref, x2_ref, w1_ref, w2_ref, b_ref, o_ref, acc_ref):
    # Same math, but with an f32 VMEM accumulator for low-precision outputs.
    k = pl.program_id(2)
    p = (jnp.dot(x1_ref[...], w1_ref[...], preferred_element_type=jnp.float32)
         + jnp.dot(x2_ref[...], w2_ref[...], preferred_element_type=jnp.float32))

    @pl.when(k == 0)
    def _():
        acc_ref[...] = p + b_ref[...]

    @pl.when(k != 0)
    def _():
        acc_ref[...] += p

    @pl.when(k == pl.num_programs(2) - 1)
    def _():
        o_ref[...] = jnp.maximum(acc_ref[...], 0.0).astype(o_ref.dtype)


# ---------------------------------------------------------------------------
# Wrappers
# ---------------------------------------------------------------------------
def combine_additive(x1, x2, *, fast_path_elems=16384):
    """relu((x1 + x2) / 2) with a lane-dense tiled Pallas kernel."""
    assert x1.shape == x2.shape, "additive mode requires equal shapes"
    n = int(x1.size)
    if n == 0:
        return x1
    if n < fast_path_elems:
        # Tiny inputs: launch/reshape overhead dominates; let XLA fuse it.
        return jnp.maximum((x1 + x2) * 0.5, 0.0)

    orig_shape = x1.shape
    target_elems = 512 * 1024  # ~2 MiB f32 per operand block

    last = orig_shape[-1] if x1.ndim >= 2 else n
    lead = n // last if x1.ndim >= 2 else 1
    if x1.ndim >= 2 and last % 128 == 0 and lead % 8 == 0:
        # Already (8,128)-aligned: tile in place, no pad / slice round-trips.
        Rp, Cp = lead, last
        x1m = x1.reshape(Rp, Cp)
        x2m = x2.reshape(Rp, Cp)
        needs_slice = False
    else:
        # Ragged: flatten into a lane-dense [rows, 512] slab, padded only to
        # the next (8,128)-aligned size (not up to a tile multiple).
        Cp = 512
        rows = -(-n // Cp)
        Rp = _round_up(rows, 8)
        pad = Rp * Cp - n
        x1f = x1.reshape(-1)
        x2f = x2.reshape(-1)
        if pad:
            x1f = jnp.pad(x1f, (0, pad))
            x2f = jnp.pad(x2f, (0, pad))
        x1m = x1f.reshape(Rp, Cp)
        x2m = x2f.reshape(Rp, Cp)
        needs_slice = True

    ct = _pick_tile(Cp, 128, 2048)
    rt = _pick_tile(Rp, 8, max(8, target_elems // ct),
                    want_multi=(Rp * Cp >= 2 * target_elems))

    out = pl.pallas_call(
        _additive_kernel,
        out_shape=jax.ShapeDtypeStruct((Rp, Cp), x1.dtype),
        grid_spec=pltpu.PrefetchScalarGridSpec(
            num_scalar_prefetch=0,
            grid=(Rp // rt, Cp // ct),
            in_specs=[
                pl.BlockSpec((rt, ct), lambda i, j: (i, j)),
                pl.BlockSpec((rt, ct), lambda i, j: (i, j)),
            ],
            out_specs=pl.BlockSpec((rt, ct), lambda i, j: (i, j)),
        ),
        compiler_params=pltpu.CompilerParams(
            dimension_semantics=("parallel", "parallel"),
            vmem_limit_bytes=_VMEM_LIMIT,
        ),
    )(x1m, x2m)

    if needs_slice:
        return out.reshape(-1)[:n].reshape(orig_shape)
    return out.reshape(orig_shape)


def combine_concat(x1, x2, w1p, w2p, bp, *, out_dim, tk, compute_dtype=None):
    """relu(x1 @ W1 + x2 @ W2 + b).

    w1p, w2p: pre-transposed weights, padded only to (x, 128): [Dp, Np].
    bp: [1, Np] f32 bias.
    """
    assert x1.shape == x2.shape
    B, D = x1.shape
    Dp, Np = w1p.shape
    out_dtype = x1.dtype

    Bp = _round_up(B, 8)  # sublane-align only; zero padding keeps math exact
    if Bp != B or Dp != D:
        x1 = jnp.pad(x1, ((0, Bp - B), (0, Dp - D)))
        x2 = jnp.pad(x2, ((0, Bp - B), (0, Dp - D)))
    if compute_dtype is not None and x1.dtype != compute_dtype:
        x1 = x1.astype(compute_dtype)
        x2 = x2.astype(compute_dtype)

    tm = _pick_tile(Bp, 8, 256)
    # If M has a single block, split N so both v7x TensorCores get work.
    tn = _pick_tile(Np, 128, 512, want_multi=(Bp // tm == 1))
    grid = (Bp // tm, Np // tn, Dp // tk)

    x_item = jnp.dtype(x1.dtype).itemsize
    w_item = jnp.dtype(w1p.dtype).itemsize
    flops = 4 * Bp * Dp * Np  # two matmuls
    bytes_accessed = (2 * Bp * Dp * x_item * (Np // tn)
                      + 2 * Dp * Np * w_item * (Bp // tm)
                      + Np * 4 + Bp * Np * jnp.dtype(out_dtype).itemsize)

    f32_out = out_dtype == jnp.float32
    kernel = _concat_linear_kernel_f32 if f32_out else _concat_linear_kernel_acc
    scratch = [] if f32_out else [pltpu.VMEM((tm, tn), jnp.float32)]

    out = pl.pallas_call(
        kernel,
        out_shape=jax.ShapeDtypeStruct((Bp, Np), out_dtype),
        grid_spec=pltpu.PrefetchScalarGridSpec(
            num_scalar_prefetch=0,
            grid=grid,
            in_specs=[
                pl.BlockSpec((tm, tk), lambda i, j, k: (i, k)),   # x1
                pl.BlockSpec((tm, tk), lambda i, j, k: (i, k)),   # x2
                pl.BlockSpec((tk, tn), lambda i, j, k: (k, j)),   # W1
                pl.BlockSpec((tk, tn), lambda i, j, k: (k, j)),   # W2
                pl.BlockSpec((1, tn), lambda i, j, k: (0, j)),    # bias
            ],
            out_specs=pl.BlockSpec((tm, tn), lambda i, j, k: (i, j)),
            scratch_shapes=scratch,
        ),
        compiler_params=pltpu.CompilerParams(
            dimension_semantics=("parallel", "parallel", "arbitrary"),
            vmem_limit_bytes=_VMEM_LIMIT,
        ),
        cost_estimate=pl.CostEstimate(
            flops=flops, transcendentals=0, bytes_accessed=bytes_accessed),
    )(x1, x2, w1p, w2p, bp)

    if Bp != B or Np != out_dim:
        out = out[:B, :out_dim]
    return out


class CombineNetwork:
    """JAX/Pallas port of the PyTorch CombineNetwork."""

    def __init__(self, input_dim, output_dim, mode='additive', key=None,
                 compute_dtype=None):
        self.mode = mode
        print('Combine Network Strategy used: ', self.mode)
        # compute_dtype=jnp.bfloat16 halves weight HBM bytes and runs the MXU
        # at native bf16 rate on v6e/v7x (f32 accumulation kept); default f32.
        self._compute_dtype = compute_dtype
        if self.mode == 'concat':
            if key is None:
                key = jax.random.PRNGKey(0)
            kw, kb = jax.random.split(key)
            fan_in = input_dim * 2
            bound = 1.0 / (fan_in ** 0.5)
            # Same layout / init bounds as nn.Linear(input_dim*2, output_dim).
            self.weight = jax.random.uniform(
                kw, (output_dim, fan_in), jnp.float32, -bound, bound)
            self.bias = jax.random.uniform(
                kb, (output_dim,), jnp.float32, -bound, bound)

            # --- Hoisted per-call work: split, transpose, pad weights ONCE. ---
            D, N = input_dim, output_dim
            Dp = _round_up(D, 128)   # lane-align only (no tile-granular overshoot)
            Np = _round_up(N, 128)
            self._tk = _pick_tile(Dp, 128, 512)
            wdt = compute_dtype if compute_dtype is not None else jnp.float32
            w1 = jnp.transpose(self.weight[:, :D])   # [D, N]
            w2 = jnp.transpose(self.weight[:, D:])   # [D, N]
            self._w1 = jnp.pad(w1, ((0, Dp - D), (0, Np - N))).astype(wdt)
            self._w2 = jnp.pad(w2, ((0, Dp - D), (0, Np - N))).astype(wdt)
            self._b = jnp.pad(self.bias.reshape(1, N), ((0, 0), (0, Np - N)))
            self._out_dim = N
            self._fast_path_flops = 2 * 1024 * 1024  # below this, plain XLA wins

    def __call__(self, input1, input2):
        if self.mode == 'concat':
            B, D = input1.shape
            if 4 * B * D * self._out_dim < self._fast_path_flops:
                # Tiny problem: kernel launch overhead dominates; use XLA.
                y = (jnp.concatenate([input1, input2], axis=1) @ self.weight.T
                     + self.bias)
                return jnp.maximum(y, 0.0)
            return combine_concat(input1, input2, self._w1, self._w2, self._b,
                                  out_dim=self._out_dim, tk=self._tk,
                                  compute_dtype=self._compute_dtype)
        elif self.mode == 'additive':
            return combine_additive(input1, input2)
        else:
            raise ValueError('incorrect option')


# ---------------------------------------------------------------------------
# Main
# ---------------------------------------------------------------------------
if __name__ == "__main__":
    key = jax.random.PRNGKey(0)
    k1, k2, kp1, k3, k4, kp2, k5, k6 = jax.random.split(key, 8)

    # --- small shapes matching the module's (batch, features) Linear layout ---
    batch, input_dim, output_dim = 8, 32, 32
    x1 = jax.random.normal(k1, (batch, input_dim), jnp.float32)
    x2 = jax.random.normal(k2, (batch, input_dim), jnp.float32)

    # additive mode (the module's default)
    net_add = CombineNetwork(input_dim, output_dim, mode='additive')
    out_add = jax.block_until_ready(net_add(x1, x2))
    ref_add = jnp.maximum((x1 + x2) / 2.0, 0.0)
    assert out_add.shape == ref_add.shape
    assert jnp.allclose(out_add, ref_add, atol=1e-6), "additive mismatch"

    # concat mode
    net_cat = CombineNetwork(input_dim, output_dim, mode='concat', key=kp1)
    out_cat = jax.block_until_ready(net_cat(x1, x2))
    ref_cat = jnp.maximum(
        jnp.concatenate([x1, x2], axis=1) @ net_cat.weight.T + net_cat.bias, 0.0)
    assert out_cat.shape == ref_cat.shape
    assert jnp.allclose(out_cat, ref_cat, atol=1e-4), "concat mismatch"

    # --- larger, non-aligned shapes: exercise the Pallas kernels ------------
    B2, D2, N2 = 260, 200, 160
    y1 = jax.random.normal(k3, (B2, D2), jnp.float32)
    y2 = jax.random.normal(k4, (B2, D2), jnp.float32)

    net_add2 = CombineNetwork(D2, N2, mode='additive')
    o_add2 = jax.block_until_ready(net_add2(y1, y2))
    assert jnp.allclose(o_add2, jnp.maximum((y1 + y2) / 2.0, 0.0), atol=1e-6)

    net_cat2 = CombineNetwork(D2, N2, mode='concat', key=kp2)
    o_cat2 = jax.block_until_ready(net_cat2(y1, y2))
    r_cat2 = jnp.maximum(
        jnp.concatenate([y1, y2], axis=1) @ net_cat2.weight.T + net_cat2.bias, 0.0)
    assert o_cat2.shape == r_cat2.shape
    assert jnp.allclose(o_cat2, r_cat2, atol=1e-4), "tiled concat mismatch"

    # --- already-aligned additive input: exercises the no-pad/no-slice path --
    z1 = jax.random.normal(k5, (64, 512), jnp.float32)
    z2 = jax.random.normal(k6, (64, 512), jnp.float32)
    o_add3 = jax.block_until_ready(combine_additive(z1, z2))
    assert jnp.allclose(o_add3, jnp.maximum((z1 + z2) / 2.0, 0.0), atol=1e-6)

    print("KERNEL_OK")
</pallas_src>

<mosaic_0001>
module attributes {stable_mosaic.version = 11 : i64} {
  func.func @_additive_kernel(%arg0: i32, %arg1: i32, %arg2: memref<104x512xf32, #tpu.memory_space<vmem>>, %arg3: memref<104x512xf32, #tpu.memory_space<vmem>>, %arg4: memref<104x512xf32, #tpu.memory_space<vmem>>) attributes {dimension_semantics = [#tpu.dimension_semantics<parallel>, #tpu.dimension_semantics<parallel>], iteration_bounds = array<i64: 1, 1>, scalar_prefetch = 0 : i64, scratch_operands = 0 : i64, tpu.core_type = #tpu.core_type<tc>, window_params = [{transform_indices = @transform_0, window_bounds = array<i64: 104, 512>}, {transform_indices = @transform_1, window_bounds = array<i64: 104, 512>}, {transform_indices = @transform_2, window_bounds = array<i64: 104, 512>}]} {
    %c0 = arith.constant 0 : index
    %c0_0 = arith.constant 0 : index
    %0 = vector.load %arg2[%c0, %c0_0] : memref<104x512xf32, #tpu.memory_space<vmem>>, vector<104x512xf32>
    %c0_1 = arith.constant 0 : index
    %c0_2 = arith.constant 0 : index
    %1 = vector.load %arg3[%c0_1, %c0_2] : memref<104x512xf32, #tpu.memory_space<vmem>>, vector<104x512xf32>
    %2 = arith.addf %0, %1 : vector<104x512xf32>
    %cst = arith.constant 5.000000e-01 : f32
    %3 = vector.broadcast %cst : f32 to vector<104x512xf32>
    %4 = arith.mulf %2, %3 : vector<104x512xf32>
    %cst_3 = arith.constant 0.000000e+00 : f32
    %5 = vector.broadcast %cst_3 : f32 to vector<104x512xf32>
    %6 = arith.maximumf %4, %5 : vector<104x512xf32>
    %c0_4 = arith.constant 0 : index
    %c0_5 = arith.constant 0 : index
    %7 = vector.load %arg4[%c0_4, %c0_5] : memref<104x512xf32, #tpu.memory_space<vmem>>, vector<104x512xf32>
    tpu.vector_store %arg4[%c0_4, %c0_5], %6 {strides = array<i32>} : memref<104x512xf32, #tpu.memory_space<vmem>>, vector<104x512xf32>,
    return
  }
  func.func @transform_0(%arg0: i32, %arg1: i32) -> (i32, i32) {
    %c0_i32 = arith.constant 0 : i32
    return %arg0, %arg1 : i32, i32
  }
  func.func @transform_1(%arg0: i32, %arg1: i32) -> (i32, i32) {
    %c0_i32 = arith.constant 0 : i32
    return %arg0, %arg1 : i32, i32
  }
  func.func @transform_2(%arg0: i32, %arg1: i32) -> (i32, i32) {
    %c0_i32 = arith.constant 0 : i32
    return %arg0, %arg1 : i32, i32
  }
}

</mosaic_0001>

<bundles_post_ra>
// kernel: tpu_custom_call.1
= control target key start
LH: loop header
LB: loop body
LE: loop exit
PB: predicated region body
PF: predicated region fallthrough
CT: control target
= control target key end

     0   :  { %7 = vsyncpa [#allocation3], 0  ;;  %s512_s0 = inlined_call_operand.hbm [shape: f32[104,512], index: 0, kind: input, shape index: {}]   ;;  %s513_s1 = inlined_call_operand.hbm [shape: f32[104,512], index: 1, kind: input, shape index: {}]   ;;  %s514_s2 = inlined_call_operand.hbm [shape: f32[104,512], index: 2, kind: output, shape index: {}]  }
   0x1   :  { %8 = vsyncpa [#allocation6], 0 }
   0x2   :  { %9 = vsyncpa [#allocation4], 0  ;;  %s447_s9 = smov [#allocation2]   ;;  %s375_s13 = scalar_lea.hbm %s512_s0, 6656 }
   0x3   :  { %s15_s10 = sshll.u32 %s447_s9, 4  ;;  %p376_p0 = scmp.ne.s32.totalorder %s512_s0, %s375_s13  ;;  %s16_s10 = int_to_ptr.vmem [resolvable:$true] %s15_s10 }
   0x4   :  { %p379_p1 = scmp.lt.u32.totalorder %s375_s13, %s512_s0 }
   0x6   :  { %p381_p2 = pnand %p379_p1, %p376_p0 }
   0x8   :  { %384 = shalt.err (!%p381_p2)
}
   0x9   :  { %s385_s18 = scalar_lea.vmem %s16_s10, 6656  ;;  %p390_p4 = scmp.lt.s32.totalorder %s16_s10, %s16_s10 }
   0xa   :  { %p386_p3 = scmp.ne.s32.totalorder %s16_s10, %s385_s18  ;;  %p391_p5 = scmp.lt.s32.totalorder %s385_s18, %s385_s18 }
   0xc   :  { %p392_p6 = por %p391_p5, %p390_p4 }
   0xe   :  { %p393_p7 = pnand %p392_p6, %p386_p3 }
  0x10   :  { %396 = shalt.err (!%p393_p7)
}
  0x11   :  { %s448_s19 = smov 512   ;;  %s449_s20 = smov 32  }
  0x12   :  { %21 = dma.hbm_to_vmem [thread:$0]  %s512_s0, 6656, %s16_s10, [#allocation3], %s448_s19, %s448_s19, %s449_s20  }
  0x13   :  { %s450_s23 = smov [#allocation5]   ;;  %s397_s27 = scalar_lea.hbm %s513_s1, 6656 }
  0x14   :  { %s27_s24 = sshll.u32 %s450_s23, 4  ;;  %p398_p8 = scmp.ne.s32.totalorder %s513_s1, %s397_s27  ;;  %s28_s24 = int_to_ptr.vmem [resolvable:$true] %s27_s24 }
  0x15   :  { %p401_p9 = scmp.lt.u32.totalorder %s397_s27, %s513_s1 }
  0x17   :  { %p403_p10 = pnand %p401_p9, %p398_p8 }
  0x19   :  { %406 = shalt.err (!%p403_p10)
}
  0x1a   :  { %s407_s4 = scalar_lea.vmem %s28_s24, 6656  ;;  %p412_p12 = scmp.lt.s32.totalorder %s28_s24, %s28_s24 }
  0x1b   :  { %p408_p11 = scmp.ne.s32.totalorder %s28_s24, %s407_s4  ;;  %p413_p13 = scmp.lt.s32.totalorder %s407_s4, %s407_s4 }
  0x1d   :  { %p414_p0 = por %p413_p13, %p412_p12 }
  0x1f   :  { %p415_p1 = pnand %p414_p0, %p408_p11 }
  0x21   :  { %418 = shalt.err (!%p415_p1)
}
  0x22   :  { %33 = dma.hbm_to_vmem [thread:$0]  %s513_s1, 6656, %s28_s24, [#allocation6], %s448_s19, %s448_s19, %s449_s20  }
  0x23   :  { %441 = dma.done.wait [#allocation3], 6656  }
  0x24   :  { %442 = vsyncadd [#allocation3], 4294960640 }
  0x25   :  { %443 = dma.done.wait [#allocation6], 6656  }
  0x26   :  { %444 = vsyncadd [#allocation6], 4294960640  ;;  %v40_v0 = vld [vmem:[#allocation2] sm:$0xff]  ;;  %v41_v2 = vld [vmem:[#allocation2 + $0x8] sm:$0xff]  ;;  %s451_s1 = smov [#allocation7]  }
  0x27   :  { %v92_v1 = vld [vmem:[#allocation5] sm:$0xff]  ;;  %v93_v4 = vld [vmem:[#allocation5 + $0x8] sm:$0xff]  ;;  %v42_v5 = vld [vmem:[#allocation2 + $0x10] sm:$0xff]  ;;  %s357_s6 = sshll.u32 %s451_s1, 4  ;;  %s358_s6 = int_to_ptr.vmem [resolvable:$true] %s357_s6 }
  0x28   :  { %v144_v3 = vadd.f32 %v92_v1, %v40_v0  ;;  %v94_v6 = vld [vmem:[#allocation5 + $0x10] sm:$0xff]  ;;  %v145_v7 = vadd.f32 %v93_v4, %v41_v2  ;;  %v43_v9 = vld [vmem:[#allocation2 + $0x18] sm:$0xff]  ;;  %v44_v11 = vld [vmem:[#allocation2 + $0x20] sm:$0xff]  ;;  %s419_s7 = scalar_lea.vmem %s358_s6, 6656  ;;  %p424_p3 = scmp.lt.s32.totalorder %s358_s6, %s358_s6 }
  0x29   :  { %v146_v8 = vadd.f32 %v94_v6, %v42_v5  ;;  %v95_v10 = vld [vmem:[#allocation5 + $0x18] sm:$0xff]  ;;  %v96_v14 = vld [vmem:[#allocation5 + $0x20] sm:$0xff]  ;;  %v45_v15 = vld [vmem:[#allocation2 + $0x28] sm:$0xff]  ;;  %p420_p2 = scmp.ne.s32.totalorder %s358_s6, %s419_s7  ;;  %p425_p4 = scmp.lt.s32.totalorder %s419_s7, %s419_s7 }
  0x2a   :  { %v196_v12 = vmul.f32 0.5, %v144_v3  ;;  %v147_v13 = vadd.f32 %v95_v10, %v43_v9  ;;  %v97_v16 = vld [vmem:[#allocation5 + $0x28] sm:$0xff]  ;;  %v197_v17 = vmul.f32 0.5, %v145_v7  ;;  %v148_v19 = vadd.f32 %v96_v14, %v44_v11  ;;  %v46_v21 = vld [vmem:[#allocation2 + $0x30] sm:$0xff]  ;;  %v47_v23 = vld [vmem:[#allocation2 + $0x38] sm:$0xff] }
  0x2b   :  { %v198_v18 = vmul.f32 0.5, %v146_v8  ;;  %v149_v20 = vadd.f32 %v97_v16, %v45_v15  ;;  %v98_v22 = vld [vmem:[#allocation5 + $0x30] sm:$0xff]  ;;  %v99_v27 = vld [vmem:[#allocation5 + $0x38] sm:$0xff]  ;;  %v48_v28 = vld [vmem:[#allocation2 + $0x40] sm:$0xff]  ;;  %p426_p5 = por %p425_p4, %p424_p3 }
  0x2c   :  { %v248_v24 = vmax.f32 %v196_v12, 0.0  ;;  %v199_v25 = vmul.f32 0.5, %v147_v13  ;;  %v150_v26 = vadd.f32 %v98_v22, %v46_v21  ;;  %v100_v29 = vld [vmem:[#allocation5 + $0x40] sm:$0xff]  ;;  %v249_v30 = vmax.f32 %v197_v17, 0.0  ;;  %v49_v34 = vld [vmem:[#allocation2 + $0x48] sm:$0xff]  ;;  %v50_v40 = vld [vmem:[#allocation2 + $0x50] sm:$0xff] }
  0x2d   :  { %v250_v31 = vmax.f32 %v198_v18, 0.0  ;;  %v200_v32 = vmul.f32 0.5, %v148_v19  ;;  %v201_v33 = vmul.f32 0.5, %v149_v20  ;;  %v101_v35 = vld [vmem:[#allocation5 + $0x48] sm:$0xff]  ;;  %v151_v38 = vadd.f32 %v99_v27, %v47_v23  ;;  %v102_v41 = vld [vmem:[#allocation5 + $0x50] sm:$0xff]  ;;  %v51_v42 = vld [vmem:[#allocation2 + $0x58] sm:$0xff]  ;;  %p427_p6 = pnand %p426_p5, %p420_p2 }
  0x2e   :  { %300 = vst [vmem:[#allocation7] sm:$0xff] %v248_v24  ;;  %v251_v36 = vmax.f32 %v199_v25, 0.0  ;;  %v202_v37 = vmul.f32 0.5, %v150_v26  ;;  %v152_v39 = vadd.f32 %v100_v29, %v48_v28  ;;  %301 = vst [vmem:[#allocation7 + $0x8] sm:$0xff] %v249_v30  ;;  %v153_v45 = vadd.f32 %v101_v35, %v49_v34  ;;  %v103_v47 = vld [vmem:[#allocation5 + $0x58] sm:$0xff]  ;;  %v52_v48 = vld [vmem:[#allocation2 + $0x60] sm:$0xff] }
  0x2f   :  { %302 = vst [vmem:[#allocation7 + $0x10] sm:$0xff] %v250_v31  ;;  %v252_v43 = vmax.f32 %v200_v32, 0.0  ;;  %v253_v44 = vmax.f32 %v201_v33, 0.0  ;;  %v154_v46 = vadd.f32 %v102_v41, %v50_v40  ;;  %v104_v49 = vld [vmem:[#allocation5 + $0x60] sm:$0xff]  ;;  %v203_v51 = vmul.f32 0.5, %v151_v38  ;;  %v53_v54 = vld [vmem:[#allocation2 + $0x68] sm:$0xff] }
  0x30   :  { %303 = vst [vmem:[#allocation7 + $0x18] sm:$0xff] %v251_v36  ;;  %v254_v50 = vmax.f32 %v202_v37, 0.0  ;;  %v204_v52 = vmul.f32 0.5, %v152_v39  ;;  %v155_v53 = vadd.f32 %v103_v47, %v51_v42  ;;  %v105_v55 = vld [vmem:[#allocation5 + $0x68] sm:$0xff]  ;;  %v54_v56 = vld [vmem:[#allocation2 + $0x70] sm:$0xff]  ;;  %v205_v57 = vmul.f32 0.5, %v153_v45 }
  0x31   :  { %304 = vst [vmem:[#allocation7 + $0x20] sm:$0xff] %v252_v43  ;;  %305 = vst [vmem:[#allocation7 + $0x28] sm:$0xff] %v253_v44  ;;  %v206_v58 = vmul.f32 0.5, %v154_v46  ;;  %v156_v59 = vadd.f32 %v104_v49, %v52_v48  ;;  %v157_v60 = vadd.f32 %v105_v55, %v53_v54  ;;  %v106_v61 = vld [vmem:[#allocation5 + $0x70] sm:$0xff]  ;;  %v55_v62 = vld [vmem:[#allocation2 + $0x78] sm:$0xff]  ;;  %v255_v0 = vmax.f32 %v203_v51, 0.0 }
  0x32   :  { %v107_v63 = vld [vmem:[#allocation5 + $0x78] sm:$0xff]  ;;  %306 = vst [vmem:[#allocation7 + $0x30] sm:$0xff] %v254_v50  ;;  %v256_v1 = vmax.f32 %v204_v52, 0.0  ;;  %v207_v2 = vmul.f32 0.5, %v155_v53  ;;  %v158_v3 = vadd.f32 %v106_v61, %v54_v56  ;;  %v56_v4 = vld [vmem:[#allocation2 + $0x80] sm:$0xff]  ;;  %v57_v6 = vld [vmem:[#allocation2 + $0x88] sm:$0xff] }
  0x33   :  { %v108_v5 = vld [vmem:[#allocation5 + $0x80] sm:$0xff]  ;;  %v257_v7 = vmax.f32 %v205_v57, 0.0  ;;  %v258_v8 = vmax.f32 %v206_v58, 0.0  ;;  %v208_v9 = vmul.f32 0.5, %v156_v59  ;;  %v209_v10 = vmul.f32 0.5, %v157_v60  ;;  %v109_v11 = vld [vmem:[#allocation5 + $0x88] sm:$0xff] }
  0x34   :  { %v58_v12 = vld [vmem:[#allocation2 + $0x90] sm:$0xff]  ;;  %307 = vst [vmem:[#allocation7 + $0x38] sm:$0xff] %v255_v0  ;;  %308 = vst [vmem:[#allocation7 + $0x40] sm:$0xff] %v256_v1  ;;  %v259_v13 = vmax.f32 %v207_v2, 0.0  ;;  %v210_v14 = vmul.f32 0.5, %v158_v3  ;;  %v159_v15 = vadd.f32 %v107_v63, %v55_v62  ;;  %v160_v16 = vadd.f32 %v108_v5, %v56_v4  ;;  %v59_v18 = vld [vmem:[#allocation2 + $0x98] sm:$0xff] }
  0x35   :  { %v110_v17 = vld [vmem:[#allocation5 + $0x90] sm:$0xff]  ;;  %v111_v19 = vld [vmem:[#allocation5 + $0x98] sm:$0xff]  ;;  %309 = vst [vmem:[#allocation7 + $0x48] sm:$0xff] %v257_v7  ;;  %310 = vst [vmem:[#allocation7 + $0x50] sm:$0xff] %v258_v8  ;;  %v260_v20 = vmax.f32 %v208_v9, 0.0  ;;  %v261_v21 = vmax.f32 %v209_v10, 0.0  ;;  %v161_v22 = vadd.f32 %v109_v11, %v57_v6 }
  0x36   :  { %v162_v23 = vadd.f32 %v110_v17, %v58_v12  ;;  %v60_v24 = vld [vmem:[#allocation2 + $0xa0] sm:$0xff]  ;;  %v61_v26 = vld [vmem:[#allocation2 + $0xa8] sm:$0xff]  ;;  %311 = vst [vmem:[#allocation7 + $0x58] sm:$0xff] %v259_v13  ;;  %v262_v27 = vmax.f32 %v210_v14, 0.0  ;;  %v211_v28 = vmul.f32 0.5, %v159_v15  ;;  %v212_v29 = vmul.f32 0.5, %v160_v16 }
  0x37   :  { %v112_v25 = vld [vmem:[#allocation5 + $0xa0] sm:$0xff]  ;;  %v163_v30 = vadd.f32 %v111_v19, %v59_v18  ;;  %v113_v31 = vld [vmem:[#allocation5 + $0xa8] sm:$0xff]  ;;  %v62_v32 = vld [vmem:[#allocation2 + $0xb0] sm:$0xff]  ;;  %312 = vst [vmem:[#allocation7 + $0x60] sm:$0xff] %v260_v20  ;;  %v213_v34 = vmul.f32 0.5, %v161_v22 }
  0x38   :  { %v114_v33 = vld [vmem:[#allocation5 + $0xb0] sm:$0xff]  ;;  %313 = vst [vmem:[#allocation7 + $0x68] sm:$0xff] %v261_v21  ;;  %v214_v35 = vmul.f32 0.5, %v162_v23  ;;  %v164_v36 = vadd.f32 %v112_v25, %v60_v24  ;;  %v165_v37 = vadd.f32 %v113_v31, %v61_v26  ;;  %v63_v38 = vld [vmem:[#allocation2 + $0xb8] sm:$0xff]  ;;  %v64_v40 = vld [vmem:[#allocation2 + $0xc0] sm:$0xff]  ;;  %v263_v41 = vmax.f32 %v211_v28, 0.0 }
  0x39   :  { %v115_v39 = vld [vmem:[#allocation5 + $0xb8] sm:$0xff]  ;;  %314 = vst [vmem:[#allocation7 + $0x70] sm:$0xff] %v262_v27  ;;  %v264_v42 = vmax.f32 %v212_v29, 0.0  ;;  %v215_v43 = vmul.f32 0.5, %v163_v30  ;;  %v166_v44 = vadd.f32 %v114_v33, %v62_v32  ;;  %v116_v45 = vld [vmem:[#allocation5 + $0xc0] sm:$0xff]  ;;  %v65_v46 = vld [vmem:[#allocation2 + $0xc8] sm:$0xff] }
  0x3a   :  { %v117_v47 = vld [vmem:[#allocation5 + $0xc8] sm:$0xff]  ;;  %v265_v48 = vmax.f32 %v213_v34, 0.0  ;;  %v266_v49 = vmax.f32 %v214_v35, 0.0  ;;  %v216_v50 = vmul.f32 0.5, %v164_v36  ;;  %v217_v51 = vmul.f32 0.5, %v165_v37  ;;  %v66_v52 = vld [vmem:[#allocation2 + $0xd0] sm:$0xff] }
  0x3b   :  { %v118_v53 = vld [vmem:[#allocation5 + $0xd0] sm:$0xff]  ;;  %315 = vst [vmem:[#allocation7 + $0x78] sm:$0xff] %v263_v41  ;;  %316 = vst [vmem:[#allocation7 + $0x80] sm:$0xff] %v264_v42  ;;  %v267_v54 = vmax.f32 %v215_v43, 0.0  ;;  %v218_v55 = vmul.f32 0.5, %v166_v44  ;;  %v167_v56 = vadd.f32 %v115_v39, %v63_v38  ;;  %v168_v57 = vadd.f32 %v116_v45, %v64_v40  ;;  %v67_v58 = vld [vmem:[#allocation2 + $0xd8] sm:$0xff] }
  0x3c   :  { %v119_v59 = vld [vmem:[#allocation5 + $0xd8] sm:$0xff]  ;;  %v68_v60 = vld [vmem:[#allocation2 + $0xe0] sm:$0xff]  ;;  %317 = vst [vmem:[#allocation7 + $0x88] sm:$0xff] %v265_v48  ;;  %318 = vst [vmem:[#allocation7 + $0x90] sm:$0xff] %v266_v49  ;;  %v268_v61 = vmax.f32 %v216_v50, 0.0  ;;  %v269_v62 = vmax.f32 %v217_v51, 0.0  ;;  %v169_v63 = vadd.f32 %v117_v47, %v65_v46  ;;  %v170_v0 = vadd.f32 %v118_v53, %v66_v52 }
  0x3d   :  { %v120_v1 = vld [vmem:[#allocation5 + $0xe0] sm:$0xff]  ;;  %v69_v2 = vld [vmem:[#allocation2 + $0xe8] sm:$0xff]  ;;  %319 = vst [vmem:[#allocation7 + $0x98] sm:$0xff] %v267_v54  ;;  %v270_v4 = vmax.f32 %v218_v55, 0.0  ;;  %v219_v5 = vmul.f32 0.5, %v167_v56  ;;  %v220_v6 = vmul.f32 0.5, %v168_v57  ;;  %v171_v7 = vadd.f32 %v119_v59, %v67_v58 }
  0x3e   :  { %v121_v3 = vld [vmem:[#allocation5 + $0xe8] sm:$0xff]  ;;  %v70_v8 = vld [vmem:[#allocation2 + $0xf0] sm:$0xff]  ;;  %v71_v10 = vld [vmem:[#allocation2 + $0xf8] sm:$0xff]  ;;  %320 = vst [vmem:[#allocation7 + $0xa0] sm:$0xff] %v268_v61  ;;  %v221_v11 = vmul.f32 0.5, %v169_v63  ;;  %v222_v12 = vmul.f32 0.5, %v170_v0  ;;  %v172_v13 = vadd.f32 %v120_v1, %v68_v60 }
  0x3f   :  { %v122_v9 = vld [vmem:[#allocation5 + $0xf0] sm:$0xff]  ;;  %321 = vst [vmem:[#allocation7 + $0xa8] sm:$0xff] %v269_v62  ;;  %v173_v14 = vadd.f32 %v121_v3, %v69_v2  ;;  %v123_v15 = vld [vmem:[#allocation5 + $0xf8] sm:$0xff]  ;;  %v72_v16 = vld [vmem:[#allocation2 + $0x100] sm:$0xff]  ;;  %v271_v18 = vmax.f32 %v219_v5, 0.0  ;;  %v272_v19 = vmax.f32 %v220_v6, 0.0 }
  0x40   :  { %v124_v17 = vld [vmem:[#allocation5 + $0x100] sm:$0xff]  ;;  %322 = vst [vmem:[#allocation7 + $0xb0] sm:$0xff] %v270_v4  ;;  %v223_v20 = vmul.f32 0.5, %v171_v7  ;;  %v174_v21 = vadd.f32 %v122_v9, %v70_v8  ;;  %v73_v22 = vld [vmem:[#allocation2 + $0x108] sm:$0xff]  ;;  %v74_v24 = vld [vmem:[#allocation2 + $0x110] sm:$0xff]  ;;  %v273_v25 = vmax.f32 %v221_v11, 0.0  ;;  %v175_v33 = vadd.f32 %v123_v15, %v71_v10 }
  0x41   :  { %v125_v23 = vld [vmem:[#allocation5 + $0x108] sm:$0xff]  ;;  %v274_v26 = vmax.f32 %v222_v12, 0.0  ;;  %v224_v27 = vmul.f32 0.5, %v172_v13  ;;  %v225_v28 = vmul.f32 0.5, %v173_v14  ;;  %v126_v29 = vld [vmem:[#allocation5 + $0x110] sm:$0xff]  ;;  %v75_v30 = vld [vmem:[#allocation2 + $0x118] sm:$0xff]  ;;  %v176_v34 = vadd.f32 %v124_v17, %v72_v16 }
  0x42   :  { %323 = vst [vmem:[#allocation7 + $0xb8] sm:$0xff] %v271_v18  ;;  %324 = vst [vmem:[#allocation7 + $0xc0] sm:$0xff] %v272_v19  ;;  %v275_v31 = vmax.f32 %v223_v20, 0.0  ;;  %v226_v32 = vmul.f32 0.5, %v174_v21  ;;  %v127_v35 = vld [vmem:[#allocation5 + $0x118] sm:$0xff]  ;;  %v76_v36 = vld [vmem:[#allocation2 + $0x120] sm:$0xff]  ;;  %v177_v40 = vadd.f32 %v125_v23, %v73_v22  ;;  %v178_v41 = vadd.f32 %v126_v29, %v74_v24 }
  0x43   :  { %v128_v37 = vld [vmem:[#allocation5 + $0x120] sm:$0xff]  ;;  %325 = vst [vmem:[#allocation7 + $0xc8] sm:$0xff] %v273_v25  ;;  %326 = vst [vmem:[#allocation7 + $0xd0] sm:$0xff] %v274_v26  ;;  %v276_v38 = vmax.f32 %v224_v27, 0.0  ;;  %v277_v39 = vmax.f32 %v225_v28, 0.0  ;;  %v77_v42 = vld [vmem:[#allocation2 + $0x128] sm:$0xff]  ;;  %v179_v48 = vadd.f32 %v127_v35, %v75_v30 }
  0x44   :  { %v129_v43 = vld [vmem:[#allocation5 + $0x128] sm:$0xff]  ;;  %v78_v44 = vld [vmem:[#allocation2 + $0x130] sm:$0xff]  ;;  %327 = vst [vmem:[#allocation7 + $0xd8] sm:$0xff] %v275_v31  ;;  %v278_v45 = vmax.f32 %v226_v32, 0.0  ;;  %v227_v46 = vmul.f32 0.5, %v175_v33  ;;  %v228_v47 = vmul.f32 0.5, %v176_v34  ;;  %v180_v54 = vadd.f32 %v128_v37, %v76_v36 }
  0x45   :  { %v130_v49 = vld [vmem:[#allocation5 + $0x130] sm:$0xff]  ;;  %v79_v50 = vld [vmem:[#allocation2 + $0x138] sm:$0xff]  ;;  %328 = vst [vmem:[#allocation7 + $0xe0] sm:$0xff] %v276_v38  ;;  %329 = vst [vmem:[#allocation7 + $0xe8] sm:$0xff] %v277_v39  ;;  %v229_v52 = vmul.f32 0.5, %v177_v40  ;;  %v230_v53 = vmul.f32 0.5, %v178_v41  ;;  %v181_v55 = vadd.f32 %v129_v43, %v77_v42 }
  0x46   :  { %v131_v51 = vld [vmem:[#allocation5 + $0x138] sm:$0xff]  ;;  %v80_v56 = vld [vmem:[#allocation2 + $0x140] sm:$0xff]  ;;  %v81_v58 = vld [vmem:[#allocation2 + $0x148] sm:$0xff]  ;;  %330 = vst [vmem:[#allocation7 + $0xf0] sm:$0xff] %v278_v45  ;;  %v279_v59 = vmax.f32 %v227_v46, 0.0  ;;  %v280_v60 = vmax.f32 %v228_v47, 0.0  ;;  %v182_v62 = vadd.f32 %v130_v49, %v78_v44 }
  0x47   :  { %v132_v57 = vld [vmem:[#allocation5 + $0x140] sm:$0xff]  ;;  %v231_v61 = vmul.f32 0.5, %v179_v48  ;;  %v133_v63 = vld [vmem:[#allocation5 + $0x148] sm:$0xff]  ;;  %v82_v0 = vld [vmem:[#allocation2 + $0x150] sm:$0xff]  ;;  %v281_v2 = vmax.f32 %v229_v52, 0.0  ;;  %v282_v3 = vmax.f32 %v230_v53, 0.0  ;;  %v183_v10 = vadd.f32 %v131_v51, %v79_v50 }
  0x48   :  { %v134_v1 = vld [vmem:[#allocation5 + $0x150] sm:$0xff]  ;;  %v232_v4 = vmul.f32 0.5, %v180_v54  ;;  %v233_v5 = vmul.f32 0.5, %v181_v55  ;;  %v83_v6 = vld [vmem:[#allocation2 + $0x158] sm:$0xff]  ;;  %331 = vst [vmem:[#allocation7 + $0xf8] sm:$0xff] %v279_v59  ;;  %332 = vst [vmem:[#allocation7 + $0x100] sm:$0xff] %v280_v60  ;;  %v184_v11 = vadd.f32 %v132_v57, %v80_v56  ;;  %v185_v17 = vadd.f32 %v133_v63, %v81_v58 }
  0x49   :  { %v135_v7 = vld [vmem:[#allocation5 + $0x158] sm:$0xff]  ;;  %v283_v8 = vmax.f32 %v231_v61, 0.0  ;;  %v234_v9 = vmul.f32 0.5, %v182_v62  ;;  %v84_v12 = vld [vmem:[#allocation2 + $0x160] sm:$0xff]  ;;  %v85_v14 = vld [vmem:[#allocation2 + $0x168] sm:$0xff]  ;;  %333 = vst [vmem:[#allocation7 + $0x108] sm:$0xff] %v281_v2  ;;  %v186_v18 = vadd.f32 %v134_v1, %v82_v0 }
  0x4a   :  { %v136_v13 = vld [vmem:[#allocation5 + $0x160] sm:$0xff]  ;;  %334 = vst [vmem:[#allocation7 + $0x110] sm:$0xff] %v282_v3  ;;  %v284_v15 = vmax.f32 %v232_v4, 0.0  ;;  %v285_v16 = vmax.f32 %v233_v5, 0.0  ;;  %v137_v19 = vld [vmem:[#allocation5 + $0x168] sm:$0xff]  ;;  %v86_v20 = vld [vmem:[#allocation2 + $0x170] sm:$0xff]  ;;  %v187_v25 = vadd.f32 %v135_v7, %v83_v6 }
  0x4b   :  { %v138_v21 = vld [vmem:[#allocation5 + $0x170] sm:$0xff]  ;;  %335 = vst [vmem:[#allocation7 + $0x118] sm:$0xff] %v283_v8  ;;  %v286_v22 = vmax.f32 %v234_v9, 0.0  ;;  %v235_v23 = vmul.f32 0.5, %v183_v10  ;;  %v236_v24 = vmul.f32 0.5, %v184_v11  ;;  %v87_v26 = vld [vmem:[#allocation2 + $0x178] sm:$0xff]  ;;  %v188_v30 = vadd.f32 %v136_v13, %v84_v12 }
  0x4c   :  { %v139_v27 = vld [vmem:[#allocation5 + $0x178] sm:$0xff]  ;;  %336 = vst [vmem:[#allocation7 + $0x120] sm:$0xff] %v284_v15  ;;  %337 = vst [vmem:[#allocation7 + $0x128] sm:$0xff] %v285_v16  ;;  %v237_v28 = vmul.f32 0.5, %v185_v17  ;;  %v238_v29 = vmul.f32 0.5, %v186_v18  ;;  %v189_v31 = vadd.f32 %v137_v19, %v85_v14  ;;  %v88_v32 = vld [vmem:[#allocation2 + $0x180] sm:$0xff]  ;;  %v190_v38 = vadd.f32 %v138_v21, %v86_v20 }
  0x4d   :  { %v140_v33 = vld [vmem:[#allocation5 + $0x180] sm:$0xff]  ;;  %v89_v34 = vld [vmem:[#allocation2 + $0x188] sm:$0xff]  ;;  %338 = vst [vmem:[#allocation7 + $0x130] sm:$0xff] %v286_v22  ;;  %v287_v35 = vmax.f32 %v235_v23, 0.0  ;;  %v288_v36 = vmax.f32 %v236_v24, 0.0  ;;  %v239_v37 = vmul.f32 0.5, %v187_v25  ;;  %v191_v50 = vadd.f32 %v139_v27, %v87_v26 }
  0x4e   :  { %v141_v39 = vld [vmem:[#allocation5 + $0x188] sm:$0xff]  ;;  %v90_v40 = vld [vmem:[#allocation2 + $0x190] sm:$0xff]  ;;  %v289_v42 = vmax.f32 %v237_v28, 0.0  ;;  %v290_v43 = vmax.f32 %v238_v29, 0.0  ;;  %v240_v44 = vmul.f32 0.5, %v188_v30  ;;  %v241_v45 = vmul.f32 0.5, %v189_v31 }
  0x4f   :  { %v142_v41 = vld [vmem:[#allocation5 + $0x190] sm:$0xff]  ;;  %v91_v46 = vld [vmem:[#allocation2 + $0x198] sm:$0xff]  ;;  %339 = vst [vmem:[#allocation7 + $0x138] sm:$0xff] %v287_v35  ;;  %340 = vst [vmem:[#allocation7 + $0x140] sm:$0xff] %v288_v36  ;;  %v291_v48 = vmax.f32 %v239_v37, 0.0  ;;  %v242_v49 = vmul.f32 0.5, %v190_v38  ;;  %v192_v51 = vadd.f32 %v140_v33, %v88_v32  ;;  %v193_v54 = vadd.f32 %v141_v39, %v89_v34 }
  0x50   :  { %v143_v47 = vld [vmem:[#allocation5 + $0x198] sm:$0xff]  ;;  %341 = vst [vmem:[#allocation7 + $0x148] sm:$0xff] %v289_v42  ;;  %342 = vst [vmem:[#allocation7 + $0x150] sm:$0xff] %v290_v43  ;;  %v292_v52 = vmax.f32 %v240_v44, 0.0  ;;  %v293_v53 = vmax.f32 %v241_v45, 0.0  ;;  %v194_v55 = vadd.f32 %v142_v41, %v90_v40  ;;  %v243_v57 = vmul.f32 0.5, %v191_v50 }
  0x51   :  { %343 = vst [vmem:[#allocation7 + $0x158] sm:$0xff] %v291_v48  ;;  %v294_v56 = vmax.f32 %v242_v49, 0.0  ;;  %v244_v58 = vmul.f32 0.5, %v192_v51  ;;  %v195_v59 = vadd.f32 %v143_v47, %v91_v46  ;;  %v245_v60 = vmul.f32 0.5, %v193_v54 }
  0x52   :  { %344 = vst [vmem:[#allocation7 + $0x160] sm:$0xff] %v292_v52  ;;  %345 = vst [vmem:[#allocation7 + $0x168] sm:$0xff] %v293_v53  ;;  %v246_v61 = vmul.f32 0.5, %v194_v55  ;;  %v295_v62 = vmax.f32 %v243_v57, 0.0 }
  0x53   :  { %346 = vst [vmem:[#allocation7 + $0x170] sm:$0xff] %v294_v56  ;;  %v296_v63 = vmax.f32 %v244_v58, 0.0  ;;  %v247_v0 = vmul.f32 0.5, %v195_v59  ;;  %v297_v1 = vmax.f32 %v245_v60, 0.0 }
  0x54   :  { %v298_v2 = vmax.f32 %v246_v61, 0.0  ;;  %347 = vst [vmem:[#allocation7 + $0x178] sm:$0xff] %v295_v62 }
  0x55   :  { %348 = vst [vmem:[#allocation7 + $0x180] sm:$0xff] %v296_v63  ;;  %v299_v3 = vmax.f32 %v247_v0, 0.0  ;;  %349 = vst [vmem:[#allocation7 + $0x188] sm:$0xff] %v297_v1 }
  0x56   :  { %350 = vst [vmem:[#allocation7 + $0x190] sm:$0xff] %v298_v2 }
  0x57   :  { %351 = vst [vmem:[#allocation7 + $0x198] sm:$0xff] %v299_v3 }
  0x58   :  { %430 = shalt.err (!%p427_p6)
}
  0x59   :  { %s431_s10 = scalar_lea.hbm %s514_s2, 6656 }
  0x5a   :  { %p432_p7 = scmp.ne.s32.totalorder %s514_s2, %s431_s10  ;;  %p435_p8 = scmp.lt.u32.totalorder %s431_s10, %s514_s2 }
  0x5c   :  { %p437_p9 = pnand %p435_p8, %p432_p7 }
  0x5e   :  { %440 = shalt.err (!%p437_p9)
}
  0x5f   :  { %363 = dma.vmem_to_hbm [thread:$0]  %s358_s6, 6656, %s514_s2, [#allocation4], %s448_s19, %s448_s19, %s449_s20  }
  0x60   :  { %445 = dma.done.wait [#allocation4], 6656  }
  0x61   :  { %446 = vsyncadd [#allocation4], 4294960640 }
  0x62   :  { %367 = vsyncpa [#allocation3], 1 }
  0x63   :  { %368 = vsyncpa [#allocation6], 1 }
  0x64   :  { %369 = vsyncpa [#allocation4], 1 }

</bundles_post_ra>
